<compile_context>
chip_gen: v7x
topology: tpu7x:2x2x1
jax: 0.10.0
libtpu: 0.0.40
codegen_flags: <defaults>
</compile_context>

<pallas_src>
import functools
import math

import jax
import jax.numpy as jnp
from jax.experimental import pallas as pl
from jax.experimental.pallas import tpu as pltpu

_LANES = 128
_MAX_PACKED_WIDTH = 512          # cap on lcm(C, 128) for the packed path
_DOT_PRECISION = jax.lax.Precision.HIGH   # bf16_3x: memory-bound on v5e, ~1e-6 err


# --------------------------------------------------------------------------- #
# Kernels
# --------------------------------------------------------------------------- #
def _ln_rows_kernel(x_ref, w_ref, b_ref, o_ref, *, eps):
    """channels_last, plain layout: x tile (TM, C), reduce over lanes (C)."""
    x = x_ref[...].astype(jnp.float32)
    mean = jnp.mean(x, axis=-1, keepdims=True)
    xc = x - mean
    var = jnp.mean(xc * xc, axis=-1, keepdims=True)
    y = xc * jax.lax.rsqrt(var + eps) * w_ref[...] + b_ref[...]
    o_ref[...] = y.astype(o_ref.dtype)


def _ln_rows_packed_kernel(x_ref, w_ref, b_ref, p_ref, o_ref, *, eps):
    """channels_last, lane-dense packed layout.

    x tile is (TM, Wp) with Wp = G*C = lcm(C, 128); each row holds G consecutive
    spatial positions.  p_ref is the constant (Wp, Wp) block-diagonal averaging
    matrix (each CxC block = 1/C), so `x @ P` is the per-position channel mean
    already broadcast back to every channel column.  The two small matmuls run
    on the MXU (HIGH precision) and stay hidden under the HBM stream.
    """
    x = x_ref[...].astype(jnp.float32)            # (TM, Wp)
    avg = p_ref[...]                              # (Wp, Wp)
    mean = jnp.dot(x, avg, preferred_element_type=jnp.float32,
                   precision=_DOT_PRECISION)
    xc = x - mean
    var = jnp.dot(xc * xc, avg, preferred_element_type=jnp.float32,
                  precision=_DOT_PRECISION)
    y = xc * jax.lax.rsqrt(var + eps) * w_ref[...] + b_ref[...]
    o_ref[...] = y.astype(o_ref.dtype)


def _ln_channels_first_kernel(x_ref, w_ref, b_ref, o_ref, *, eps):
    """channels_first: x tile (TN, C, T_HW); reduce over the channel axis (1).

    Spatial positions sit on the lane axis, channels on sublanes; several batch
    images can share one block (TN > 1) when the spatial extent is small.
    weight/bias come in as (1, C, 1) and broadcast across batch and lanes.
    """
    x = x_ref[...].astype(jnp.float32)            # (TN, C, T_HW)
    mean = jnp.mean(x, axis=1, keepdims=True)     # (TN, 1, T_HW)
    xc = x - mean
    var = jnp.mean(xc * xc, axis=1, keepdims=True)
    y = xc * jax.lax.rsqrt(var + eps) * w_ref[...] + b_ref[...]
    o_ref[...] = y.astype(o_ref.dtype)


# --------------------------------------------------------------------------- #
# Tiling helpers
# --------------------------------------------------------------------------- #
def _tile_params():
    """Returns (vmem_limit_bytes, target_block_bytes) for this chip generation.

    v5e/v6e (128 MiB physical VMEM): 96 MiB scoped limit, ~8 MiB input blocks.
    v7x (64 MiB physical): 48 MiB scoped limit, ~4 MiB input blocks.
    Unknown / query failure: conservative v7x numbers (safe everywhere).
    """
    cap = 64 * 1024 * 1024
    try:
        cap = int(getattr(pltpu.get_tpu_info(), "vmem_capacity_bytes", cap))
    except Exception:
        pass
    vmem_limit = int(min(cap * 3 // 4, 96 * 1024 * 1024))
    target = 8 * 1024 * 1024 if cap >= 96 * 1024 * 1024 else 4 * 1024 * 1024
    return vmem_limit, target


def _pick_tile(total_units, bytes_per_unit, unit_multiple, vmem_limit,
               target_block_bytes, itemsize):
    """Units (rows, lane-columns or images) per block along the tiled axis.

    Sized so that (a) the 4 double-buffered pipeline blocks plus ~3 f32-sized
    in-kernel temporaries fit under the scoped VMEM limit, (b) each input block
    is roughly `target_block_bytes` so per-step DMA dwarfs the ~0.35 us fixed
    pipeline overhead, and (c) non-tiny arrays get >=2 (>=4 when large) grid
    steps so v7x's two TensorCores are both used and DMA overlaps compute.
    """
    if total_units <= unit_multiple:
        return total_units                      # full extent: always legal
    # (a) VMEM ceiling: in+out double-buffered + f32 temporaries (grow 2x/4x for
    #     bf16/int8 inputs because the temporaries are f32-sized).
    per_unit_vmem = bytes_per_unit * (4 + 3 * (4 // max(itemsize, 1)))
    t_vmem = max(unit_multiple, vmem_limit // per_unit_vmem)
    # (b) byte-based per-block target.
    t_target = max(unit_multiple, target_block_bytes // bytes_per_unit)
    t = min(t_vmem, t_target)
    # (c) minimum grid-step count for megacore sharding / pipeline overlap.
    total_bytes = total_units * bytes_per_unit
    if total_bytes >= 16 * 1024 * 1024:
        want_steps = 4
    elif total_bytes >= 2 * 1024 * 1024:
        want_steps = 2
    else:
        want_steps = 1
    if want_steps > 1:
        t = min(t, max(unit_multiple, total_units // want_steps))
    t = max(unit_multiple, (t // unit_multiple) * unit_multiple)
    return min(t, total_units)


def _sublane_multiple(dtype):
    return {4: 8, 2: 16, 1: 32}.get(jnp.dtype(dtype).itemsize, 8)


# --------------------------------------------------------------------------- #
# Wrappers
# --------------------------------------------------------------------------- #
def _layer_norm_channels_last(x, weight, bias, eps):
    """LayerNorm over the last axis of x (any leading shape)."""
    C = x.shape[-1]
    orig_shape = x.shape
    R = x.size // C
    itemsize = jnp.dtype(x.dtype).itemsize
    sub_mult = _sublane_multiple(x.dtype)
    vmem_limit, target = _tile_params()

    w = weight.astype(jnp.float32)
    b = bias.astype(jnp.float32)

    # Lane-dense packed path: pack G = lcm(C,128)/C positions per vreg row so the
    # last (lane) dim is a multiple of 128.  Covers C = 1..64 powers of two as
    # well as ConvNeXt-style C = 96 / 192 (Wp = 384).
    Wp = math.lcm(C, _LANES)
    G = Wp // C
    use_packed = (C % _LANES != 0) and (Wp <= _MAX_PACKED_WIDTH)
    pad_rows = (-R) % G if use_packed else 0
    if pad_rows and C >= 64:
        # With >=50% lane utilisation the plain path is cheaper than the extra
        # full-array copy a tail pad would cost, so only pad for narrow C.
        use_packed = False
        pad_rows = 0

    if use_packed:
        flat = x.reshape(-1)
        if pad_rows:
            # Tail packing group padded with zeros (finite results, sliced off
            # below).  XLA materialises the pad/slice as copies; only taken for
            # narrow C where the plain path's lane waste would cost more.
            flat = jnp.concatenate(
                [flat, jnp.zeros((pad_rows * C,), dtype=x.dtype)])
        Rp = (R + pad_rows) // G
        x2d = flat.reshape(Rp, Wp)
        tm = _pick_tile(Rp, Wp * itemsize, sub_mult, vmem_limit, target, itemsize)
        grid = (pl.cdiv(Rp, tm),)

        w_tiled = jnp.tile(w, G).reshape(1, Wp)
        b_tiled = jnp.tile(b, G).reshape(1, Wp)
        # Block-diagonal averaging matrix: P[i, j] = 1/C iff i//C == j//C.
        avg_mat = jnp.kron(jnp.eye(G, dtype=jnp.float32),
                           jnp.full((C, C), 1.0 / C, dtype=jnp.float32))

        out = pl.pallas_call(
            functools.partial(_ln_rows_packed_kernel, eps=eps),
            out_shape=jax.ShapeDtypeStruct((Rp, Wp), x.dtype),
            grid_spec=pltpu.PrefetchScalarGridSpec(
                num_scalar_prefetch=0,
                grid=grid,
                in_specs=[
                    pl.BlockSpec((tm, Wp), lambda i: (i, 0)),
                    pl.BlockSpec((1, Wp), lambda i: (0, 0)),
                    pl.BlockSpec((1, Wp), lambda i: (0, 0)),
                    pl.BlockSpec((Wp, Wp), lambda i: (0, 0)),
                ],
                out_specs=pl.BlockSpec((tm, Wp), lambda i: (i, 0)),
            ),
            compiler_params=pltpu.CompilerParams(
                dimension_semantics=("parallel",),
                vmem_limit_bytes=vmem_limit,
            ),
        )(x2d, w_tiled, b_tiled, avg_mat)
        out_flat = out.reshape(-1)
        if pad_rows:
            out_flat = out_flat[: R * C]
        return out_flat.reshape(orig_shape)

    # Plain path: C is a multiple of 128 (already lane-dense) or too wide /
    # awkward to pack.  Ragged last block: OOB rows are garbage that only feed
    # their own (masked) outputs, since all reductions are per-row.
    x2d = x.reshape(R, C)
    tm = _pick_tile(R, C * itemsize, sub_mult, vmem_limit, target, itemsize)
    grid = (pl.cdiv(R, tm),)

    out = pl.pallas_call(
        functools.partial(_ln_rows_kernel, eps=eps),
        out_shape=jax.ShapeDtypeStruct((R, C), x.dtype),
        grid_spec=pltpu.PrefetchScalarGridSpec(
            num_scalar_prefetch=0,
            grid=grid,
            in_specs=[
                pl.BlockSpec((tm, C), lambda i: (i, 0)),
                pl.BlockSpec((1, C), lambda i: (0, 0)),
                pl.BlockSpec((1, C), lambda i: (0, 0)),
            ],
            out_specs=pl.BlockSpec((tm, C), lambda i: (i, 0)),
        ),
        compiler_params=pltpu.CompilerParams(
            dimension_semantics=("parallel",),
            vmem_limit_bytes=vmem_limit,
        ),
    )(x2d, w.reshape(1, C), b.reshape(1, C))
    return out.reshape(orig_shape)


def _layer_norm_channels_first(x, weight, bias, eps):
    """LayerNorm over axis 1 of an NCHW tensor, with no transpose glue."""
    N, C, H, W = x.shape
    HW = H * W
    x3d = x.reshape(N, C, HW)
    itemsize = jnp.dtype(x.dtype).itemsize
    vmem_limit, target = _tile_params()

    # Tile the spatial (lane) axis per image; for small feature maps (late
    # ConvNeXt stages, 7x7 / 14x14) the whole spatial extent fits one block, so
    # batch several images per grid step instead (keeps DMAs large and gives the
    # grid multiple steps for pipelining / v7x megacore).
    t_hw = _pick_tile(HW, C * itemsize, _LANES, vmem_limit, target, itemsize)
    if t_hw >= HW:
        t_hw = HW
        t_n = _pick_tile(N, C * HW * itemsize, 1, vmem_limit, target, itemsize)
    else:
        t_n = 1
    grid = (pl.cdiv(N, t_n), pl.cdiv(HW, t_hw))

    w = weight.astype(jnp.float32).reshape(1, C, 1)
    b = bias.astype(jnp.float32).reshape(1, C, 1)

    out = pl.pallas_call(
        functools.partial(_ln_channels_first_kernel, eps=eps),
        out_shape=jax.ShapeDtypeStruct((N, C, HW), x.dtype),
        grid_spec=pltpu.PrefetchScalarGridSpec(
            num_scalar_prefetch=0,
            grid=grid,
            in_specs=[
                pl.BlockSpec((t_n, C, t_hw), lambda n, j: (n, 0, j)),
                pl.BlockSpec((1, C, 1), lambda n, j: (0, 0, 0)),
                pl.BlockSpec((1, C, 1), lambda n, j: (0, 0, 0)),
            ],
            out_specs=pl.BlockSpec((t_n, C, t_hw), lambda n, j: (n, 0, j)),
        ),
        compiler_params=pltpu.CompilerParams(
            dimension_semantics=("parallel", "parallel"),
            vmem_limit_bytes=vmem_limit,
        ),
    )(x3d, w, b)
    return out.reshape(N, C, H, W)


class LayerNormPallas:
    """JAX/Pallas port of the ConvNeXt LayerNorm module (forward only)."""

    def __init__(self, normalized_shape, eps=1e-6, data_format="channels_last"):
        if data_format not in ("channels_last", "channels_first"):
            raise NotImplementedError
        self.eps = eps
        self.data_format = data_format
        self.normalized_shape = (normalized_shape,)
        # Matches nn.Parameter(torch.ones / torch.zeros)
        self.weight = jnp.ones((normalized_shape,), dtype=jnp.float32)
        self.bias = jnp.zeros((normalized_shape,), dtype=jnp.float32)

    def __call__(self, x):
        C = self.normalized_shape[0]
        if self.data_format == "channels_last":
            assert x.shape[-1] == C
            return _layer_norm_channels_last(x, self.weight, self.bias, self.eps)
        else:  # channels_first: (N, C, H, W)
            assert x.shape[1] == C
            return _layer_norm_channels_first(x, self.weight, self.bias, self.eps)


# --------------------------------------------------------------------------- #
# References (match the PyTorch module's two branches)
# --------------------------------------------------------------------------- #
def _reference_channels_first(x, w, b, eps):
    x = x.astype(jnp.float32)
    u = jnp.mean(x, axis=1, keepdims=True)
    s = jnp.mean((x - u) ** 2, axis=1, keepdims=True)
    xn = (x - u) / jnp.sqrt(s + eps)
    return w[None, :, None, None] * xn + b[None, :, None, None]


def _reference_channels_last(x, w, b, eps):
    x = x.astype(jnp.float32)
    u = jnp.mean(x, axis=-1, keepdims=True)
    s = jnp.mean((x - u) ** 2, axis=-1, keepdims=True)
    xn = (x - u) / jnp.sqrt(s + eps)
    return xn * w + b


if __name__ == "__main__":
    key = jax.random.PRNGKey(0)
    k1, k2, k3, k4, k5, k6, k7 = jax.random.split(key, 7)

    N, C, H, W = 2, 4, 16, 16

    # 1) channels_first (NCHW): dedicated kernel, no transpose glue.
    x_cf = jax.random.normal(k1, (N, C, H, W), dtype=jnp.float32)
    ln_cf = LayerNormPallas(C, eps=1e-6, data_format="channels_first")
    ln_cf.weight = jnp.arange(1.0, C + 1.0, dtype=jnp.float32) * 0.5
    ln_cf.bias = jnp.arange(C, dtype=jnp.float32) * 0.1
    y_cf = jax.block_until_ready(ln_cf(x_cf))
    ref_cf = _reference_channels_first(x_cf, ln_cf.weight, ln_cf.bias, ln_cf.eps)
    assert jnp.allclose(y_cf, ref_cf, atol=1e-5, rtol=1e-5), "channels_first mismatch"

    # 2) channels_last (NHWC) small C -> lane-dense packed path (Wp=128).
    x_cl = jax.random.normal(k2, (N, H, W, C), dtype=jnp.float32)
    ln_cl = LayerNormPallas(C, eps=1e-6, data_format="channels_last")
    ln_cl.weight = jnp.arange(1.0, C + 1.0, dtype=jnp.float32) * 0.25
    ln_cl.bias = -jnp.arange(C, dtype=jnp.float32) * 0.2
    y_cl = jax.block_until_ready(ln_cl(x_cl))
    ref_cl = _reference_channels_last(x_cl, ln_cl.weight, ln_cl.bias, ln_cl.eps)
    assert jnp.allclose(y_cl, ref_cl, atol=1e-4, rtol=1e-4), "packed(128) mismatch"

    # 3) channels_last C=96 (ConvNeXt width) -> lcm-packed path (Wp=384, G=4).
    x96 = jax.random.normal(k3, (2500, 96), dtype=jnp.float32)
    ln96 = LayerNormPallas(96, eps=1e-6, data_format="channels_last")
    y96 = jax.block_until_ready(ln96(x96))
    ref96 = _reference_channels_last(x96, ln96.weight, ln96.bias, ln96.eps)
    assert jnp.allclose(y96, ref96, atol=1e-4, rtol=1e-4), "packed(384) mismatch"

    # 4) channels_last C=4 with R % G != 0 -> padded-tail packed path.
    x_tail = jax.random.normal(k4, (2, 5, 5, 4), dtype=jnp.float32)
    ln_tail = LayerNormPallas(4, eps=1e-6, data_format="channels_last")
    y_tail = jax.block_until_ready(ln_tail(x_tail))
    ref_tail = _reference_channels_last(x_tail, ln_tail.weight, ln_tail.bias, ln_tail.eps)
    assert jnp.allclose(y_tail, ref_tail, atol=1e-4, rtol=1e-4), "packed tail mismatch"

    # 5) channels_last C=768 (multiple of 128) with a ragged multi-step grid ->
    #    plain lane-dense path + masked last block.
    x_plain = jax.random.normal(k5, (2070, 768), dtype=jnp.float32)
    ln_plain = LayerNormPallas(768, eps=1e-6, data_format="channels_last")
    y_plain = jax.block_until_ready(ln_plain(x_plain))
    ref_plain = _reference_channels_last(x_plain, ln_plain.weight, ln_plain.bias, ln_plain.eps)
    assert jnp.allclose(y_plain, ref_plain, atol=1e-5, rtol=1e-5), "plain path mismatch"

    # 6) channels_first with small spatial extent (7x7) -> batched-N blocks.
    x_small = jax.random.normal(k6, (8, 8, 7, 7), dtype=jnp.float32)
    ln_small = LayerNormPallas(8, eps=1e-6, data_format="channels_first")
    y_small = jax.block_until_ready(ln_small(x_small))
    ref_small = _reference_channels_first(x_small, ln_small.weight, ln_small.bias, ln_small.eps)
    assert jnp.allclose(y_small, ref_small, atol=1e-5, rtol=1e-5), "batched-N mismatch"

    # 7) bf16 channels_last (packed path, f32 compute, bf16 output rounding).
    x_bf = jax.random.normal(k7, (4, 8, 8, 16), dtype=jnp.bfloat16)
    ln_bf = LayerNormPallas(16, eps=1e-6, data_format="channels_last")
    y_bf = jax.block_until_ready(ln_bf(x_bf))
    ref_bf = _reference_channels_last(x_bf, ln_bf.weight, ln_bf.bias, ln_bf.eps)
    assert jnp.allclose(y_bf.astype(jnp.float32), ref_bf, atol=2e-2, rtol=2e-2), \
        "bf16 packed mismatch"

    print("KERNEL_OK")
</pallas_src>

<mosaic_0001>
module attributes {stable_mosaic.version = 11 : i64} {
  func.func @_ln_channels_first_kernel(%arg0: i32, %arg1: i32, %arg2: memref<2x4x256xf32, #tpu.memory_space<vmem>>, %arg3: memref<1x4x1xf32, #tpu.memory_space<vmem>>, %arg4: memref<1x4x1xf32, #tpu.memory_space<vmem>>, %arg5: memref<2x4x256xf32, #tpu.memory_space<vmem>>) attributes {dimension_semantics = [#tpu.dimension_semantics<parallel>, #tpu.dimension_semantics<parallel>], iteration_bounds = array<i64: 1, 1>, scalar_prefetch = 0 : i64, scratch_operands = 0 : i64, tpu.core_type = #tpu.core_type<tc>, window_params = [{transform_indices = @transform_0, window_bounds = array<i64: 2, 4, 256>}, {pipeline_mode = #tpu.pipeline_mode<synchronous>, transform_indices = @transform_1, window_bounds = array<i64: 1, 4, 1>}, {pipeline_mode = #tpu.pipeline_mode<synchronous>, transform_indices = @transform_2, window_bounds = array<i64: 1, 4, 1>}, {transform_indices = @transform_3, window_bounds = array<i64: 2, 4, 256>}]} {
    %c0 = arith.constant 0 : index
    %c0_0 = arith.constant 0 : index
    %c0_1 = arith.constant 0 : index
    %0 = vector.load %arg2[%c0, %c0_0, %c0_1] : memref<2x4x256xf32, #tpu.memory_space<vmem>>, vector<2x4x256xf32>
    %cst = arith.constant dense<0.000000e+00> : vector<2x256xf32>
    %1 = vector.multi_reduction <add>, %0, %cst [1] : vector<2x4x256xf32> to vector<2x256xf32>
    %2 = vector.shape_cast %1 : vector<2x256xf32> to vector<2x1x256xf32>
    %cst_2 = arith.constant 4.000000e+00 : f32
    %3 = vector.broadcast %cst_2 : f32 to vector<2x1x256xf32>
    %4 = arith.divf %2, %3 : vector<2x1x256xf32>
    %5 = vector.broadcast %4 : vector<2x1x256xf32> to vector<2x4x256xf32>
    %6 = arith.subf %0, %5 : vector<2x4x256xf32>
    %7 = arith.mulf %6, %6 : vector<2x4x256xf32>
    %cst_3 = arith.constant dense<0.000000e+00> : vector<2x256xf32>
    %8 = vector.multi_reduction <add>, %7, %cst_3 [1] : vector<2x4x256xf32> to vector<2x256xf32>
    %9 = vector.shape_cast %8 : vector<2x256xf32> to vector<2x1x256xf32>
    %cst_4 = arith.constant 4.000000e+00 : f32
    %10 = vector.broadcast %cst_4 : f32 to vector<2x1x256xf32>
    %11 = arith.divf %9, %10 : vector<2x1x256xf32>
    %cst_5 = arith.constant 9.99999997E-7 : f32
    %12 = vector.broadcast %cst_5 : f32 to vector<2x1x256xf32>
    %13 = arith.addf %11, %12 : vector<2x1x256xf32>
    %14 = math.rsqrt %13 : vector<2x1x256xf32>
    %15 = vector.broadcast %14 : vector<2x1x256xf32> to vector<2x4x256xf32>
    %16 = arith.mulf %6, %15 : vector<2x4x256xf32>
    %c0_6 = arith.constant 0 : index
    %c0_7 = arith.constant 0 : index
    %c0_8 = arith.constant 0 : index
    %17 = vector.load %arg3[%c0_6, %c0_7, %c0_8] : memref<1x4x1xf32, #tpu.memory_space<vmem>>, vector<1x4x1xf32>
    %18 = vector.broadcast %17 : vector<1x4x1xf32> to vector<2x4x256xf32>
    %19 = arith.mulf %16, %18 : vector<2x4x256xf32>
    %c0_9 = arith.constant 0 : index
    %c0_10 = arith.constant 0 : index
    %c0_11 = arith.constant 0 : index
    %20 = vector.load %arg4[%c0_9, %c0_10, %c0_11] : memref<1x4x1xf32, #tpu.memory_space<vmem>>, vector<1x4x1xf32>
    %21 = vector.broadcast %20 : vector<1x4x1xf32> to vector<2x4x256xf32>
    %22 = arith.addf %19, %21 : vector<2x4x256xf32>
    %c0_12 = arith.constant 0 : index
    %c0_13 = arith.constant 0 : index
    %c0_14 = arith.constant 0 : index
    %23 = vector.load %arg5[%c0_12, %c0_13, %c0_14] : memref<2x4x256xf32, #tpu.memory_space<vmem>>, vector<2x4x256xf32>
    tpu.vector_store %arg5[%c0_12, %c0_13, %c0_14], %22 {strides = array<i32>} : memref<2x4x256xf32, #tpu.memory_space<vmem>>, vector<2x4x256xf32>,
    return
  }
  func.func @transform_0(%arg0: i32, %arg1: i32) -> (i32, i32, i32) {
    %c0_i32 = arith.constant 0 : i32
    %c0_i32_0 = arith.constant 0 : i32
    return %arg0, %c0_i32, %arg1 : i32, i32, i32
  }
  func.func @transform_1(%arg0: i32, %arg1: i32) -> (i32, i32, i32) {
    %c0_i32 = arith.constant 0 : i32
    %c0_i32_0 = arith.constant 0 : i32
    %c0_i32_1 = arith.constant 0 : i32
    %c0_i32_2 = arith.constant 0 : i32
    return %c0_i32, %c0_i32_0, %c0_i32_1 : i32, i32, i32
  }
  func.func @transform_2(%arg0: i32, %arg1: i32) -> (i32, i32, i32) {
    %c0_i32 = arith.constant 0 : i32
    %c0_i32_0 = arith.constant 0 : i32
    %c0_i32_1 = arith.constant 0 : i32
    %c0_i32_2 = arith.constant 0 : i32
    return %c0_i32, %c0_i32_0, %c0_i32_1 : i32, i32, i32
  }
  func.func @transform_3(%arg0: i32, %arg1: i32) -> (i32, i32, i32) {
    %c0_i32 = arith.constant 0 : i32
    %c0_i32_0 = arith.constant 0 : i32
    return %arg0, %c0_i32, %arg1 : i32, i32, i32
  }
}

</mosaic_0001>

<bundles_post_ra>
// kernel: tpu_custom_call.1
= control target key start
LH: loop header
LB: loop body
LE: loop exit
PB: predicated region body
PF: predicated region fallthrough
CT: control target
= control target key end

     0   :  { %8 = vsyncpa [#allocation3], 0  ;;  %s323_s0 = inlined_call_operand.hbm [shape: f32[2,4,256], index: 0, kind: input, shape index: {}]   ;;  %s324_s1 = inlined_call_operand.vmem [shape: f32[1,4,1], index: 1, kind: input, shape index: {}]   ;;  %s325_s2 = inlined_call_operand.vmem [shape: f32[1,4,1], index: 2, kind: input, shape index: {}]   ;;  %s326_s3 = inlined_call_operand.hbm [shape: f32[2,4,256], index: 3, kind: output, shape index: {}]  }
   0x1   :  { %9 = vsyncpa [#allocation4], 0  ;;  %s253_s12 = smov [#allocation2]   ;;  %s205_s16 = scalar_lea.hbm %s323_s0, 256 }
   0x2   :  { %s15_s13 = sshll.u32 %s253_s12, 4  ;;  %p206_p0 = scmp.ne.s32.totalorder %s323_s0, %s205_s16  ;;  %s16_s13 = int_to_ptr.vmem [resolvable:$true] %s15_s13 }
   0x3   :  { %p209_p1 = scmp.lt.u32.totalorder %s205_s16, %s323_s0 }
   0x5   :  { %p211_p2 = pnand %p209_p1, %p206_p0 }
   0x7   :  { %214 = shalt.err (!%p211_p2)
}
   0x8   :  { %s215_s21 = scalar_lea.vmem %s16_s13, 256  ;;  %p220_p4 = scmp.lt.s32.totalorder %s16_s13, %s16_s13 }
   0x9   :  { %p216_p3 = scmp.ne.s32.totalorder %s16_s13, %s215_s21  ;;  %p221_p5 = scmp.lt.s32.totalorder %s215_s21, %s215_s21 }
   0xb   :  { %p222_p6 = por %p221_p5, %p220_p4 }
   0xd   :  { %p223_p7 = pnand %p222_p6, %p216_p3 }
   0xf   :  { %226 = shalt.err (!%p223_p7)
}
  0x10   :  { %s254_s22 = smov 128   ;;  %s255_s23 = smov 8  }
  0x11   :  { %21 = dma.hbm_to_vmem [thread:$0]  %s323_s0, 256, %s16_s13, [#allocation3], %s254_s22, %s254_s22, %s255_s23  }
  0x12   :  { %249 = dma.done.wait [#allocation3], 256  }
  0x13   :  { %250 = vsyncadd [#allocation3], 4294967040  ;;  %v256_v0 = vmov 0   ;;  %v139_v1 = vld [vmem:[%s324_s1] sm:$0xf]  ;;  %v30_v4 = vld [vmem:[#allocation2 + $0x8] sm:$0xff] }
  0x14   :  { %194 = vset.pattern.permute.xlu0 %v256_v0  ;;  %v154_v2 = vld [vmem:[%s325_s2] sm:$0xf]  ;;  %vm37_vm0 = vcmask 1043456   ;;  %v34_v6 = vcombine.high %v30_v4, %v30_v4  ;;  %s258_s0 = smov [#allocation5]  }
  0x15   :  { %142 = vperm.xlu0 %194, %v139_v1   ;;  %v29_v3 = vld [vmem:[#allocation2] sm:$0xff]  ;;  %v52_v9 = vsel %vm37_vm0, %v30_v4, 0.0  ;;  %s176_s1 = sshll.u32 %s258_s0, 4  ;;  %s177_s1 = int_to_ptr.vmem [resolvable:$true] %s176_s1 }
  0x16   :  { %v33_v5 = vcombine.high %v29_v3, %v29_v3  ;;  %v38_v7 = vsel %vm37_vm0, %v29_v3, 0.0  ;;  %v59_v10 = vsel %vm37_vm0, %v34_v6, 0.0  ;;  %v53_v13 = vrot.slane %v52_v9, 4  ;;  %s227_s2 = scalar_lea.vmem %s177_s1, 256  ;;  %p232_p9 = scmp.lt.s32.totalorder %s177_s1, %s177_s1 }
  0x17   :  { %v39_v11 = vrot.slane %v38_v7, 4  ;;  %v60_v14 = vrot.slane %v59_v10, 4  ;;  %p228_p8 = scmp.ne.s32.totalorder %s177_s1, %s227_s2  ;;  %p233_p10 = scmp.lt.s32.totalorder %s227_s2, %s227_s2 }
  0x18   :  { %v45_v8 = vsel %vm37_vm0, %v33_v5, 0.0  ;;  %v54_v17 = vadd.f32 %v53_v13, %v52_v9 }
  0x19   :  { %157 = vperm.xlu0 %194, %v154_v2   ;;  %v46_v12 = vrot.slane %v45_v8, 4  ;;  %v40_v15 = vadd.f32 %v39_v11, %v38_v7  ;;  %v61_v18 = vadd.f32 %v60_v14, %v59_v10  ;;  %p234_p11 = por %p233_p10, %p232_p9 }
  0x1a   :  { %v55_v21 = vrot.slane %v54_v17, 2 }
  0x1b   :  { %v47_v16 = vadd.f32 %v46_v12, %v45_v8  ;;  %v41_v19 = vrot.slane %v40_v15, 2  ;;  %v62_v22 = vrot.slane %v61_v18, 2  ;;  %p235_p12 = pnand %p234_p11, %p228_p8 }
  0x1c   :  { %v56_v25 = vadd.f32 %v55_v21, %v54_v17  ;;  %v147_v21 = vlaneseq }
  0x1d   :  { %v48_v20 = vrot.slane %v47_v16, 2  ;;  %v42_v23 = vadd.f32 %v41_v19, %v40_v15  ;;  %v63_v26 = vadd.f32 %v62_v22, %v61_v18  ;;  %v257_v19 = vmov 839922192  }
  0x1e   :  { %v57_v29 = vrot.slane %v56_v25, 1 }
  0x1f   :  { %v49_v24 = vadd.f32 %v48_v20, %v47_v16  ;;  %v43_v27 = vrot.slane %v42_v23, 1  ;;  %v64_v30 = vrot.slane %v63_v26, 1  ;;  %v145_v20 = vunpack.c.l.s4 %v257_v19 }
  0x20   :  { %v58_v33 = vadd.f32 %v57_v29, %v56_v25 }
  0x21   :  { %v50_v28 = vrot.slane %v49_v24, 1  ;;  %v44_v31 = vadd.f32 %v43_v27, %v42_v23  ;;  %v65_v34 = vadd.f32 %v64_v30, %v63_v26  ;;  %v146_v25 = vunpack.c.0.s8 %v145_v20 }
  0x22   :  { %v69_v37 = vmul.f32 0.25, %v58_v33  ;;  %v148_v26 = vshrl.u32 %v147_v21, 7 }
  0x23   :  { %v51_v32 = vadd.f32 %v50_v28, %v49_v24  ;;  %v67_v35 = vmul.f32 0.25, %v44_v31  ;;  %v70_v38 = vmul.f32 0.25, %v65_v34 }
  0x24   :  { %v149_v28 = vsub.s32 %v146_v25, %v148_v26 }
  0x25   :  { %v68_v36 = vmul.f32 0.25, %v51_v32  ;;  %v76_v40 = vcombine.low %v69_v37, %v70_v38 }
  0x27   :  { %v75_v39 = vcombine.low %v67_v35, %v68_v36  ;;  %v80_v42 = vsub.f32 %v30_v4, %v76_v40 }
  0x29   :  { %v79_v41 = vsub.f32 %v29_v3, %v75_v39  ;;  %v82_v44 = vmul.f32 %v80_v42, %v80_v42 }
  0x2b   :  { %v81_v43 = vmul.f32 %v79_v41, %v79_v41  ;;  %v86_v46 = vcombine.high %v82_v44, %v82_v44  ;;  %v103_v48 = vsel %vm37_vm0, %v82_v44, 0.0 }
  0x2c   :  { %v104_v52 = vrot.slane %v103_v48, 4 }
  0x2d   :  { %v85_v45 = vcombine.high %v81_v43, %v81_v43  ;;  %v89_v47 = vsel %vm37_vm0, %v81_v43, 0.0  ;;  %v110_v51 = vsel %vm37_vm0, %v86_v46, 0.0 }
  0x2e   :  { %v90_v50 = vrot.slane %v89_v47, 4  ;;  %v111_v54 = vrot.slane %v110_v51, 4  ;;  %v105_v56 = vadd.f32 %v104_v52, %v103_v48 }
  0x2f   :  { %v96_v49 = vsel %vm37_vm0, %v85_v45, 0.0 }
  0x30   :  { %v97_v53 = vrot.slane %v96_v49, 4  ;;  %v91_v55 = vadd.f32 %v90_v50, %v89_v47  ;;  %v112_v58 = vadd.f32 %v111_v54, %v110_v51  ;;  %v106_v60 = vrot.slane %v105_v56, 2 }
  0x32   :  { %v98_v57 = vadd.f32 %v97_v53, %v96_v49  ;;  %v92_v59 = vrot.slane %v91_v55, 2  ;;  %v113_v62 = vrot.slane %v112_v58, 2  ;;  %v107_v0 = vadd.f32 %v106_v60, %v105_v56 }
  0x34   :  { %v99_v61 = vrot.slane %v98_v57, 2  ;;  %v93_v63 = vadd.f32 %v92_v59, %v91_v55  ;;  %v114_v2 = vadd.f32 %v113_v62, %v112_v58  ;;  %v108_v4 = vrot.slane %v107_v0, 1 }
  0x36   :  { %v100_v1 = vadd.f32 %v99_v61, %v98_v57  ;;  %v94_v3 = vrot.slane %v93_v63, 1  ;;  %v115_v6 = vrot.slane %v114_v2, 1  ;;  %v109_v8 = vadd.f32 %v108_v4, %v107_v0 }
  0x38   :  { %v101_v5 = vrot.slane %v100_v1, 1  ;;  %v95_v7 = vadd.f32 %v94_v3, %v93_v63  ;;  %v116_v10 = vadd.f32 %v115_v6, %v114_v2  ;;  %v119_v12 = vmul.f32 0.25, %v109_v8 }
  0x3a   :  { %v102_v9 = vadd.f32 %v101_v5, %v100_v1  ;;  %v117_v11 = vmul.f32 0.25, %v95_v7  ;;  %v120_v14 = vmul.f32 0.25, %v116_v10  ;;  %v123_v16 = vadd.f32 1e-06, %v119_v12 }
  0x3c   :  { %v118_v13 = vmul.f32 0.25, %v102_v9  ;;  %v121_v15 = vadd.f32 1e-06, %v117_v11  ;;  %v124_v18 = vadd.f32 1e-06, %v120_v14 }
  0x3e   :  { %v122_v17 = vadd.f32 1e-06, %v118_v13  ;;  %197 = vrsqrt.f32 %v121_v15 }
  0x3f   :  { %199 = vrsqrt.f32 %v123_v16 }
  0x40   :  { %201 = vrsqrt.f32 %v122_v17 }
  0x41   :  { %203 = vrsqrt.f32 %v124_v18 }
  0x48   :  { %v198_v22 = vpop.eup %197 }
  0x49   :  { %v200_v23 = vpop.eup %199 }
  0x4a   :  { %v202_v24 = vpop.eup %201 }
  0x4b   :  { %v204_v27 = vpop.eup %203  ;;  %v133_v29 = vcombine.low %v198_v22, %v202_v24 }
  0x4c   :  { %v134_v30 = vcombine.low %v200_v23, %v204_v27 }
  0x4d   :  { %v137_v32 = vmul.f32 %v133_v29, %v79_v41 }
  0x4e   :  { %v138_v33 = vmul.f32 %v134_v30, %v80_v42 }
  0x94   :  { %v143_v31 = vpop.permute.xlu0 %142 }
  0x95   :  { %v150_v34 = vrot.slane %v143_v31, %v149_v28 }
  0x97   :  { %v152_v36 = vmul.f32 %v150_v34, %v137_v32  ;;  %v153_v37 = vmul.f32 %v150_v34, %v138_v33 }
  0x98   :  { %v158_v35 = vpop.permute.xlu0 %157 }
  0x99   :  { %v165_v38 = vrot.slane %v158_v35, %v149_v28 }
  0x9b   :  { %v167_v39 = vadd.f32 %v165_v38, %v152_v36  ;;  %v168_v40 = vadd.f32 %v165_v38, %v153_v37 }
  0x9d   :  { %169 = vst [vmem:[#allocation5] sm:$0xff] %v167_v39  ;;  %170 = vst [vmem:[#allocation5 + $0x8] sm:$0xff] %v168_v40 }
  0x9e   :  { %238 = shalt.err (!%p235_p12)
}
  0x9f   :  { %s239_s5 = scalar_lea.hbm %s326_s3, 256 }
  0xa0   :  { %p240_p13 = scmp.ne.s32.totalorder %s326_s3, %s239_s5  ;;  %p243_p0 = scmp.lt.u32.totalorder %s239_s5, %s326_s3 }
  0xa2   :  { %p245_p1 = pnand %p243_p0, %p240_p13 }
  0xa4   :  { %248 = shalt.err (!%p245_p1)
}
  0xa5   :  { %182 = dma.vmem_to_hbm [thread:$0]  %s177_s1, 256, %s326_s3, [#allocation4], %s254_s22, %s254_s22, %s255_s23  }
  0xa6   :  { %251 = dma.done.wait [#allocation4], 256  }
  0xa7   :  { %252 = vsyncadd [#allocation4], 4294967040 }
  0xa8   :  { %186 = vsyncpa [#allocation3], 1 }
  0xa9   :  { %187 = vsyncpa [#allocation4], 1 }

</bundles_post_ra>
